<compile_context>
chip_gen: v6e
topology: v6e:2x2x1
jax: 0.10.0
libtpu: 0.0.40
codegen_flags: <defaults>
</compile_context>

<pallas_src>
import functools

import jax
import jax.numpy as jnp
from jax.experimental import pallas as pl
from jax.experimental.pallas import tpu as pltpu


_PAD_MODES = {
    "zero": "constant",
    "refl": "reflect",
    "reflect": "reflect",
    "repl": "edge",
    "replicate": "edge",
    "circular": "wrap",
}


def _normalize_pad_sizes(pad_sizes):
    """PyTorch pad layers take an int or (left, right, top, bottom)."""
    if isinstance(pad_sizes, int):
        return (pad_sizes,) * 4
    assert len(pad_sizes) == 4
    return tuple(int(p) for p in pad_sizes)


def _round_up(n, m):
    return ((n + m - 1) // m) * m


# ------------------------------ Pallas kernel --------------------------------

def _filter_kernel(x_ref, f_ref, o_ref, *, kh, kw, scale_l2, eps,
                   top, left, hin, win):
    """Fused depthwise KxK 'valid' conv + optional per-plane L2 rescale.

    x_ref: (Tn, Hp, Wp)  padded planes, one plane per (batch, channel) pair
    f_ref: (kh*kw,)      shared filter taps (SMEM scalars)
    o_ref: (Tn, Ho, Wo)  with Ho = Hp-kh+1, Wo = Wp-kw+1
    """
    ho = o_ref.shape[1]
    wo = o_ref.shape[2]

    # PyTorch conv2d = cross-correlation: out[h,w] = sum_ij f[i,j]*x[h+i,w+j].
    # Each tap is a windowed load directly off the VMEM ref (no copies).
    acc = x_ref[:, 0:ho, 0:wo] * f_ref[0]
    for i in range(kh):
        for j in range(kw):
            if i == 0 and j == 0:
                continue
            acc = acc + x_ref[:, i:i + ho, j:j + wo] * f_ref[i * kw + j]

    if scale_l2:
        # ||x||_2 over the ORIGINAL (un-padded) window and ||out||_2, per plane.
        xo = x_ref[:, top:top + hin, left:left + win]
        inp_sq = jnp.sum(jnp.sum(xo * xo, axis=2, keepdims=True),
                         axis=1, keepdims=True)
        out_sq = jnp.sum(jnp.sum(acc * acc, axis=2, keepdims=True),
                         axis=1, keepdims=True)
        acc = acc * (jnp.sqrt(inp_sq) / (jnp.sqrt(out_sq) + eps))

    o_ref[...] = acc.astype(o_ref.dtype)


# ------------------------------ module wrapper --------------------------------

def filter_forward(x, filt, *, pad_type=None, pad_sizes=None,
                   scale_l2=False, eps=1e-6):
    """Pallas forward of `Filter`.

    x:    (B, C, H, W)
    filt: (kh, kw) -- the module replicates this 2D filter across channels
                      (filt[None, None].repeat(C, 1, 1, 1)), so passing the
                      2D filter is exact.
    """
    B, C, H, W = x.shape
    kh, kw = filt.shape

    # Pad layer (separate nn.Module in the spec) -> jnp.pad in the wrapper.
    if pad_sizes is not None:
        left, right, top, bottom = _normalize_pad_sizes(pad_sizes)
        xp = jnp.pad(x, ((0, 0), (0, 0), (top, bottom), (left, right)),
                     mode=_PAD_MODES[pad_type])
    else:
        left = top = 0
        xp = x
    Hp, Wp = xp.shape[2], xp.shape[3]
    Ho, Wo = Hp - kh + 1, Wp - kw + 1
    assert Ho >= 1 and Wo >= 1

    N = B * C
    planes = xp.reshape(N, Hp, Wp).astype(jnp.float32)   # reshape only, no transpose
    taps = filt.reshape(-1).astype(jnp.float32)          # (kh*kw,) SMEM scalars

    # Plane-tile size: ~2 MiB of (8,128)-padded VMEM per pipeline buffer, but
    # keep >= ~8 grid steps so the DMA pipeline (and the second TensorCore on
    # v7x) has work to overlap. Pick a divisor of N so no ragged blocks.
    in_plane_bytes = _round_up(Hp, 8) * _round_up(Wp, 128) * 4
    out_plane_bytes = _round_up(Ho, 8) * _round_up(Wo, 128) * 4
    per_plane = in_plane_bytes + out_plane_bytes
    tn_cap = max(1, min(N, (2 * 1024 * 1024) // per_plane))
    tn_target = max(1, min(tn_cap, N // min(N, 8)))
    tn = 1
    for d in range(tn_target, 0, -1):
        if N % d == 0:
            tn = d
            break
    grid = (N // tn,)

    out = pl.pallas_call(
        functools.partial(_filter_kernel, kh=kh, kw=kw, scale_l2=scale_l2,
                          eps=eps, top=top, left=left, hin=H, win=W),
        out_shape=jax.ShapeDtypeStruct((N, Ho, Wo), jnp.float32),
        grid=grid,
        in_specs=[
            pl.BlockSpec((tn, Hp, Wp), lambda n: (n, 0, 0)),
            pl.BlockSpec(memory_space=pltpu.MemorySpace.SMEM),   # filter taps
        ],
        out_specs=pl.BlockSpec((tn, Ho, Wo), lambda n: (n, 0, 0)),
        compiler_params=pltpu.CompilerParams(
            dimension_semantics=("parallel",),
            vmem_limit_bytes=32 * 1024 * 1024,
        ),
    )(planes, taps)

    return out.reshape(B, C, Ho, Wo).astype(x.dtype)


# --------------------------- pure-JAX reference -------------------------------

def filter_forward_ref(x, filt, *, pad_type=None, pad_sizes=None,
                       scale_l2=False, eps=1e-6):
    B, C, H, W = x.shape
    kh, kw = filt.shape
    if scale_l2:
        inp_norm = jnp.sqrt(jnp.sum(x * x, axis=(-2, -1), keepdims=True))
    if pad_sizes is not None:
        left, right, top, bottom = _normalize_pad_sizes(pad_sizes)
        x = jnp.pad(x, ((0, 0), (0, 0), (top, bottom), (left, right)),
                    mode=_PAD_MODES[pad_type])
    w = jnp.broadcast_to(filt.astype(jnp.float32), (C, 1, kh, kw))
    out = jax.lax.conv_general_dilated(
        x.astype(jnp.float32), w, window_strides=(1, 1), padding="VALID",
        dimension_numbers=("NCHW", "OIHW", "NCHW"), feature_group_count=C,
        precision=jax.lax.Precision.HIGHEST)
    if scale_l2:
        out_norm = jnp.sqrt(jnp.sum(out * out, axis=(-2, -1), keepdims=True))
        out = out * (inp_norm / (out_norm + eps))
    return out


# ----------------------------------- main -------------------------------------

if __name__ == "__main__":
    key = jax.random.PRNGKey(0)

    B, C, H, W = 2, 8, 32, 32
    x = jax.random.normal(key, (B, C, H, W), jnp.float32)

    # 3x3 binomial anti-aliasing filter: the typical `filt` buffer.
    f1d = jnp.array([1.0, 2.0, 1.0], jnp.float32)
    filt = jnp.outer(f1d, f1d)
    filt = filt / jnp.sum(filt)

    # Config 1: reflection pad + L2 rescale (exercises every branch).
    fwd = jax.jit(functools.partial(filter_forward, pad_type="reflect",
                                    pad_sizes=(1, 1, 1, 1), scale_l2=True,
                                    eps=1e-6))
    out = jax.block_until_ready(fwd(x, filt))
    assert out.shape == (B, C, H, W) and out.dtype == jnp.float32
    ref = filter_forward_ref(x, filt, pad_type="reflect", pad_sizes=(1, 1, 1, 1),
                             scale_l2=True, eps=1e-6)
    err = float(jnp.max(jnp.abs(out - ref)))
    assert err < 1e-4, f"pad + scale_l2 mismatch: {err}"

    # Config 2: no pad, no rescale (valid conv shrinks the spatial dims).
    fwd2 = jax.jit(filter_forward)
    out2 = jax.block_until_ready(fwd2(x, filt))
    assert out2.shape == (B, C, H - 2, W - 2)
    ref2 = filter_forward_ref(x, filt)
    err2 = float(jnp.max(jnp.abs(out2 - ref2)))
    assert err2 < 1e-4, f"valid-conv mismatch: {err2}"

    print("KERNEL_OK")
</pallas_src>

<mosaic_0001>
module attributes {stable_mosaic.version = 11 : i64} {
  func.func @_filter_kernel(%arg0: i32, %arg1: memref<2x34x34xf32, #tpu.memory_space<vmem>>, %arg2: memref<9xf32, #tpu.memory_space<smem>>, %arg3: memref<2x32x32xf32, #tpu.memory_space<vmem>>) attributes {dimension_semantics = [#tpu.dimension_semantics<parallel>], iteration_bounds = array<i64: 8>, scalar_prefetch = 0 : i64, scratch_operands = 0 : i64, tpu.core_type = #tpu.core_type<tc>, window_params = [{transform_indices = @transform_0, window_bounds = array<i64: 2, 34, 34>}, {transform_indices = @transform_1, window_bounds = array<i64: 9>}, {transform_indices = @transform_2, window_bounds = array<i64: 2, 32, 32>}]} {
    %c0 = arith.constant 0 : index
    %c0_0 = arith.constant 0 : index
    %c0_1 = arith.constant 0 : index
    %0 = vector.load %arg1[%c0, %c0_0, %c0_1] : memref<2x34x34xf32, #tpu.memory_space<vmem>>, vector<2x32x32xf32>
    %c0_2 = arith.constant 0 : index
    %1 = memref.load %arg2[%c0_2] : memref<9xf32, #tpu.memory_space<smem>>
    %2 = vector.broadcast %1 : f32 to vector<2x32x32xf32>
    %3 = arith.mulf %0, %2 : vector<2x32x32xf32>
    %c0_3 = arith.constant 0 : index
    %c0_4 = arith.constant 0 : index
    %c1 = arith.constant 1 : index
    %4 = vector.load %arg1[%c0_3, %c0_4, %c1] : memref<2x34x34xf32, #tpu.memory_space<vmem>>, vector<2x32x32xf32>
    %c1_5 = arith.constant 1 : index
    %5 = memref.load %arg2[%c1_5] : memref<9xf32, #tpu.memory_space<smem>>
    %6 = vector.broadcast %5 : f32 to vector<2x32x32xf32>
    %7 = arith.mulf %4, %6 : vector<2x32x32xf32>
    %8 = arith.addf %3, %7 : vector<2x32x32xf32>
    %c0_6 = arith.constant 0 : index
    %c0_7 = arith.constant 0 : index
    %c2 = arith.constant 2 : index
    %9 = vector.load %arg1[%c0_6, %c0_7, %c2] : memref<2x34x34xf32, #tpu.memory_space<vmem>>, vector<2x32x32xf32>
    %c2_8 = arith.constant 2 : index
    %10 = memref.load %arg2[%c2_8] : memref<9xf32, #tpu.memory_space<smem>>
    %11 = vector.broadcast %10 : f32 to vector<2x32x32xf32>
    %12 = arith.mulf %9, %11 : vector<2x32x32xf32>
    %13 = arith.addf %8, %12 : vector<2x32x32xf32>
    %c0_9 = arith.constant 0 : index
    %c1_10 = arith.constant 1 : index
    %c0_11 = arith.constant 0 : index
    %14 = vector.load %arg1[%c0_9, %c1_10, %c0_11] : memref<2x34x34xf32, #tpu.memory_space<vmem>>, vector<2x32x32xf32>
    %c3 = arith.constant 3 : index
    %15 = memref.load %arg2[%c3] : memref<9xf32, #tpu.memory_space<smem>>
    %16 = vector.broadcast %15 : f32 to vector<2x32x32xf32>
    %17 = arith.mulf %14, %16 : vector<2x32x32xf32>
    %18 = arith.addf %13, %17 : vector<2x32x32xf32>
    %c0_12 = arith.constant 0 : index
    %c1_13 = arith.constant 1 : index
    %c1_14 = arith.constant 1 : index
    %19 = vector.load %arg1[%c0_12, %c1_13, %c1_14] : memref<2x34x34xf32, #tpu.memory_space<vmem>>, vector<2x32x32xf32>
    %c4 = arith.constant 4 : index
    %20 = memref.load %arg2[%c4] : memref<9xf32, #tpu.memory_space<smem>>
    %21 = vector.broadcast %20 : f32 to vector<2x32x32xf32>
    %22 = arith.mulf %19, %21 : vector<2x32x32xf32>
    %23 = arith.addf %18, %22 : vector<2x32x32xf32>
    %c0_15 = arith.constant 0 : index
    %c1_16 = arith.constant 1 : index
    %c2_17 = arith.constant 2 : index
    %24 = vector.load %arg1[%c0_15, %c1_16, %c2_17] : memref<2x34x34xf32, #tpu.memory_space<vmem>>, vector<2x32x32xf32>
    %c5 = arith.constant 5 : index
    %25 = memref.load %arg2[%c5] : memref<9xf32, #tpu.memory_space<smem>>
    %26 = vector.broadcast %25 : f32 to vector<2x32x32xf32>
    %27 = arith.mulf %24, %26 : vector<2x32x32xf32>
    %28 = arith.addf %23, %27 : vector<2x32x32xf32>
    %c0_18 = arith.constant 0 : index
    %c2_19 = arith.constant 2 : index
    %c0_20 = arith.constant 0 : index
    %29 = vector.load %arg1[%c0_18, %c2_19, %c0_20] : memref<2x34x34xf32, #tpu.memory_space<vmem>>, vector<2x32x32xf32>
    %c6 = arith.constant 6 : index
    %30 = memref.load %arg2[%c6] : memref<9xf32, #tpu.memory_space<smem>>
    %31 = vector.broadcast %30 : f32 to vector<2x32x32xf32>
    %32 = arith.mulf %29, %31 : vector<2x32x32xf32>
    %33 = arith.addf %28, %32 : vector<2x32x32xf32>
    %c0_21 = arith.constant 0 : index
    %c2_22 = arith.constant 2 : index
    %c1_23 = arith.constant 1 : index
    %34 = vector.load %arg1[%c0_21, %c2_22, %c1_23] : memref<2x34x34xf32, #tpu.memory_space<vmem>>, vector<2x32x32xf32>
    %c7 = arith.constant 7 : index
    %35 = memref.load %arg2[%c7] : memref<9xf32, #tpu.memory_space<smem>>
    %36 = vector.broadcast %35 : f32 to vector<2x32x32xf32>
    %37 = arith.mulf %34, %36 : vector<2x32x32xf32>
    %38 = arith.addf %33, %37 : vector<2x32x32xf32>
    %c0_24 = arith.constant 0 : index
    %c2_25 = arith.constant 2 : index
    %c2_26 = arith.constant 2 : index
    %39 = vector.load %arg1[%c0_24, %c2_25, %c2_26] : memref<2x34x34xf32, #tpu.memory_space<vmem>>, vector<2x32x32xf32>
    %c8 = arith.constant 8 : index
    %40 = memref.load %arg2[%c8] : memref<9xf32, #tpu.memory_space<smem>>
    %41 = vector.broadcast %40 : f32 to vector<2x32x32xf32>
    %42 = arith.mulf %39, %41 : vector<2x32x32xf32>
    %43 = arith.addf %38, %42 : vector<2x32x32xf32>
    %c0_27 = arith.constant 0 : index
    %c1_28 = arith.constant 1 : index
    %c1_29 = arith.constant 1 : index
    %44 = vector.load %arg1[%c0_27, %c1_28, %c1_29] : memref<2x34x34xf32, #tpu.memory_space<vmem>>, vector<2x32x32xf32>
    %45 = arith.mulf %44, %44 : vector<2x32x32xf32>
    %cst = arith.constant dense<0.000000e+00> : vector<2x32xf32>
    %46 = vector.multi_reduction <add>, %45, %cst [2] : vector<2x32x32xf32> to vector<2x32xf32>
    %47 = vector.shape_cast %46 : vector<2x32xf32> to vector<2x32x1xf32>
    %cst_30 = arith.constant dense<0.000000e+00> : vector<2x1xf32>
    %48 = vector.multi_reduction <add>, %47, %cst_30 [1] : vector<2x32x1xf32> to vector<2x1xf32>
    %49 = vector.shape_cast %48 : vector<2x1xf32> to vector<2x1x1xf32>
    %50 = arith.mulf %43, %43 : vector<2x32x32xf32>
    %cst_31 = arith.constant dense<0.000000e+00> : vector<2x32xf32>
    %51 = vector.multi_reduction <add>, %50, %cst_31 [2] : vector<2x32x32xf32> to vector<2x32xf32>
    %52 = vector.shape_cast %51 : vector<2x32xf32> to vector<2x32x1xf32>
    %cst_32 = arith.constant dense<0.000000e+00> : vector<2x1xf32>
    %53 = vector.multi_reduction <add>, %52, %cst_32 [1] : vector<2x32x1xf32> to vector<2x1xf32>
    %54 = vector.shape_cast %53 : vector<2x1xf32> to vector<2x1x1xf32>
    %55 = math.sqrt %49 : vector<2x1x1xf32>
    %56 = math.sqrt %54 : vector<2x1x1xf32>
    %cst_33 = arith.constant 9.99999997E-7 : f32
    %57 = vector.broadcast %cst_33 : f32 to vector<2x1x1xf32>
    %58 = arith.addf %56, %57 : vector<2x1x1xf32>
    %59 = arith.divf %55, %58 : vector<2x1x1xf32>
    %60 = vector.broadcast %59 : vector<2x1x1xf32> to vector<2x32x32xf32>
    %61 = arith.mulf %43, %60 : vector<2x32x32xf32>
    %c0_34 = arith.constant 0 : index
    %c0_35 = arith.constant 0 : index
    %c0_36 = arith.constant 0 : index
    %62 = vector.load %arg3[%c0_34, %c0_35, %c0_36] : memref<2x32x32xf32, #tpu.memory_space<vmem>>, vector<2x32x32xf32>
    tpu.vector_store %arg3[%c0_34, %c0_35, %c0_36], %61 {strides = array<i32>} : memref<2x32x32xf32, #tpu.memory_space<vmem>>, vector<2x32x32xf32>,
    return
  }
  func.func @transform_0(%arg0: i32) -> (i32, i32, i32) {
    %c0_i32 = arith.constant 0 : i32
    %c0_i32_0 = arith.constant 0 : i32
    %c0_i32_1 = arith.constant 0 : i32
    return %arg0, %c0_i32, %c0_i32_0 : i32, i32, i32
  }
  func.func @transform_1(%arg0: i32) -> i32 {
    %c0_i32 = arith.constant 0 : i32
    %c0_i32_0 = arith.constant 0 : i32
    return %c0_i32 : i32
  }
  func.func @transform_2(%arg0: i32) -> (i32, i32, i32) {
    %c0_i32 = arith.constant 0 : i32
    %c0_i32_0 = arith.constant 0 : i32
    %c0_i32_1 = arith.constant 0 : i32
    return %arg0, %c0_i32, %c0_i32_0 : i32, i32, i32
  }
}

</mosaic_0001>

<bundles_post_ra>
// kernel: filter_forward.1
= control target key start
LH: loop header
LB: loop body
LE: loop exit
PB: predicated region body
PF: predicated region fallthrough
CT: control target
= control target key end

     0   :  { %7 = vsyncpa [#allocation4], 0  ;;  %s1403_s0 = inlined_call_operand.vmem [shape: f32[16,34,34], index: 0, kind: input, shape index: {}]   ;;  %s1404_s1 = inlined_call_operand.vmem [shape: f32[9], index: 1, kind: input, shape index: {}]   ;;  %s1405_s2 = inlined_call_operand.hbm [shape: f32[16,32,32], index: 2, kind: output, shape index: {}]  }
   0x1   :  { %8 = vsyncpa [#allocation3], 0 }
   0x2   :  { %10 = vsyncpa [#allocation3 + $0x1], 0  ;;  %s998_s9 = smov 0   ;;  %s1000_s10 = smov 0  }
   0x3   :  { %s1002_s11 = smov 0   ;;  %s1004_s12 = smov 0  }
   0x4 LB: > { %s1019_s13 = sadd.s32 4294967295, %s975_s12   ;;  %s804_s14 = sadd.s32 4294967294, %s975_s12   ;;  %s975_s12 = sphi %s1004_s12, %s1412_s12   ;;  %s971_s11 = sphi %s1002_s11, %s1411_s11   ;;  %s967_s10 = sphi %s1000_s10, %s1410_s10   ;;  %s963_s9 = sphi %s998_s9, %s1409_s9  }
   0x5   : > { %s1023_s15 = sadd.s32 1, %s975_s12   ;;  %s70_s16 = sadd.s32 1, %s971_s11 }
   0x6   : > { %s67_s17 = ssub.s32 %s975_s12, %s1023_s15  ;;  %p80_p0 = scmp.ne.s32.totalorder %s971_s11, %s967_s10 }
   0x7   : > { %p68_p1 = scmp.eq.s32.totalorder %s67_s17, 0  ;;  %p81_p2 = scmp.eq.s32.totalorder %s1019_s13, 7 }
   0x8   : > { %p86_p3 = scmp.ne.s32.totalorder %s967_s10, %s963_s9  ;;  %p87_p4 = scmp.eq.s32.totalorder %s804_s14, 7 }
   0x9   : > { %s1034_s18 = scalar_select %p68_p1, %s971_s11, %s70_s16  }
   0xa   : > { %p1036_p5 = por %p81_p2, %p80_p0  ;;  %p1040_p6 = por %p87_p4, %p86_p3 }
   0xb   : > { %p805_p7 = scmp.ge.s32.totalorder %s975_s12, 1  ;;  %p94_p8 = scmp.lt.s32.totalorder %s975_s12, 9 }
   0xc   : > { %p844_p9 = scmp.eq.s32.totalorder %s1019_s13, 0  ;;  %s107_s24 = sshll.u32 %s1404_s1, 4  ;;  %s108_s24 = int_to_ptr.vmem [resolvable:$true] %s107_s24 }
   0xd   : > { %p1047_p10 = pnand %p805_p7, %p94_p8  ;;  %s896_s25 = scalar_lea.vmem %s108_s24, 16 }
   0xe   : > { %p897_p13 = scmp.ne.s32.totalorder %s108_s24, %s896_s25  ;;  %p904_p3 = scmp.lt.s32.totalorder %s108_s24, %s108_s24 }
   0xf   : > { %p836_p11 = pneg %p1047_p10  ;;  %p905_p4 = scmp.lt.s32.totalorder %s896_s25, %s896_s25 }
  0x11   : > { %p837_p12 = pnand %p844_p9, %p836_p11  ;;  %p906_p7 = por %p905_p4, %p904_p3 }
  0x13   : > { %p898_p0 = pneg %p837_p12 }
  0x15   : > { %p899_p1 = pnand %p898_p0, %p897_p13 }
  0x17   : > { %p900_p2 = pneg %p899_p1 }
  0x19   : > { %p907_p8 = pnand %p906_p7, %p900_p2 }
  0x1b   : > { %910 = shalt.err (!%p907_p8)
}
  0x1c   : > { %s977_s26 = smov [#allocation2]   ;;  %130 = sbr.rel (%p1047_p10) target bundleno = 465 (0x1d1), region = 28 }
  0x1d   : > { %839 = dma.vmem_to_smem (!%p837_p12), %s108_s24, 16, %s977_s26, [#allocation4]  }
  0x21   : > { %954 = dma.done.wait (%p844_p9), [#allocation4], 16  }
  0x22   : > { %956 = vsyncadd (%p844_p9), [#allocation4], 4294967280 }
  0x23   : > { %136 = sfence }
  0x24   : > { %s811_s27 = sshll.u32 %s1019_s13, 1  ;;  %s813_s28 = sld [smem:[#allocation2 + $0x1]]  ;;  %vm572_vm0 = vcmask 261120  }
  0x25   : > { %p155_p11 = scmp.lt.s32.totalorder %s811_s27, 15  ;;  %s814_s5 = sld [smem:[#allocation2 + $0x2]] }
  0x26   : > { %s978_s6 = smov 127   ;;  %s979_s7 = smov 126  }
  0x27   : > { %s1414_s27 = smov (!%p155_p11, %s811_s27), 15  ;;  %s816_s8 = sld [smem:[#allocation2 + $0x4]] }
  0x28   : > { %s829_s29 = smul.u32 40, %s1414_s27  ;;  %s817_s14 = sld [smem:[#allocation2 + $0x5]] }
  0x29   : > { %s819_s16 = sld [smem:[#allocation2 + $0x7]]  ;;  %s151_s24 = sand.u32 1, %s967_s10  }
  0x2a   : > { %v181_v0 = vstv %s813_s28  ;;  %s1068_s4 = scalar_lea.vmem %s1403_s0, %s829_s29  ;;  %s820_s17 = sld [smem:[#allocation2 + $0x8]] }
  0x2b   : > { %v1071_v1 = vld [vmem:[%s1068_s4 + $0x28] sm:$0xff]  ;;  %v1074_v2 = vld [vmem:[%s1068_s4] sm:$0xff]  ;;  %v1077_v3 = vld [vmem:[%s1068_s4 + $0x30] sm:$0xff]  ;;  %v231_v13 = vstv %s814_s5  ;;  %s170_s21 = sld [smem:[#allocation2]]  ;;  %s810_s25 = sshll.u32 %s151_s24, 6 }
  0x2c   : > { %v186_v4 = vmul.f32 %v181_v0, %v1071_v1  ;;  %v182_v5 = vmul.f32 %v181_v0, %v1074_v2  ;;  %v1082_v6 = vld [vmem:[%s1068_s4 + $0x8] sm:$0xff]  ;;  %v187_v7 = vmul.f32 %v181_v0, %v1077_v3  ;;  %v1089_v9 = vld [vmem:[%s1068_s4 + $0x38] sm:$0xff]  ;;  %v1092_v10 = vld [vmem:[%s1068_s4 + $0x10] sm:$0xff]  ;;  %v232_v15 = vmul.f32 %v231_v13, %v1074_v2  ;;  %s815_s22 = sld [smem:[#allocation2 + $0x3]]  ;;  %s828_s26 = sshll.u32 %s1019_s13, 10 }
  0x2d   : > { %v183_v8 = vmul.f32 %v181_v0, %v1082_v6  ;;  %v188_v11 = vmul.f32 %v181_v0, %v1089_v9  ;;  %v184_v12 = vmul.f32 %v181_v0, %v1092_v10  ;;  %v233_v14 = vmul.f32 %v231_v13, %v1082_v6  ;;  %v1107_v18 = vld [vmem:[%s1068_s4 + $0x40] sm:$0xff]  ;;  %v1110_v19 = vld [vmem:[%s1068_s4 + $0x18] sm:$0xff]  ;;  %v1125_v26 = vld [vmem:[%s1068_s4 + $0x9] sm:$0xff]  ;;  %s818_s23 = sld [smem:[#allocation2 + $0x6]]  ;;  %s153_s27 = scalar_lea.vmem [#allocation5], %s810_s25 }
  0x2e   : > { %206 = vrot.lane.b32.xlu1 %v186_v4, %s978_s6  ;;  %198 = vrot.lane.b32.xlu0 %v182_v5, %s978_s6  ;;  %v237_v16 = vmul.f32 %v231_v13, %v1077_v3  ;;  %v236_v17 = vmul.f32 %v231_v13, %v1071_v1  ;;  %v189_v20 = vmul.f32 %v181_v0, %v1107_v18  ;;  %v307_v27 = vstv %s816_s8  ;;  %v1128_v28 = vld [vmem:[%s1068_s4 + $0x1] sm:$0xff]  ;;  %s730_s28 = sshll.u32 %s153_s27, 4  ;;  %s1345_s3 = scalar_lea.hbm %s1405_s2, %s828_s26  ;;  %s1347_s28 = int_to_ptr.vmem [resolvable:$true] %s730_s28 }
  0x2f   : > { %v185_v21 = vmul.f32 %v181_v0, %v1110_v19  ;;  %v238_v22 = vmul.f32 %v231_v13, %v1089_v9  ;;  %v234_v23 = vmul.f32 %v231_v13, %v1092_v10  ;;  %v239_v24 = vmul.f32 %v231_v13, %v1107_v18  ;;  %v1135_v31 = vld [vmem:[%s1068_s4 + $0x31] sm:$0xff]  ;;  %v1138_v32 = vld [vmem:[%s1068_s4 + $0x29] sm:$0xff]  ;;  %v1145_v35 = vld [vmem:[%s1068_s4 + $0x39] sm:$0xff]  ;;  %s1363_s13 = scalar_lea.sflag [#allocation3], %s151_s24  ;;  %s980_s5 = smov [#allocation5]  }
  0x30   : > { %v235_v25 = vmul.f32 %v231_v13, %v1110_v19  ;;  %v309_v29 = vmul.f32 %v307_v27, %v1125_v26  ;;  %v308_v30 = vmul.f32 %v307_v27, %v1128_v28  ;;  %v313_v33 = vmul.f32 %v307_v27, %v1135_v31  ;;  %v1148_v36 = vld [vmem:[%s1068_s4 + $0x11] sm:$0xff]  ;;  %v1163_v44 = vld [vmem:[%s1068_s4 + $0x41] sm:$0xff]  ;;  %v1166_v45 = vld [vmem:[%s1068_s4 + $0x19] sm:$0xff] }
  0x31   : > { %v312_v34 = vmul.f32 %v307_v27, %v1138_v32  ;;  %v314_v37 = vmul.f32 %v307_v27, %v1145_v35  ;;  %v310_v38 = vmul.f32 %v307_v27, %v1148_v36  ;;  %v357_v39 = vstv %s817_s14  ;;  %v1181_v52 = vld [vmem:[%s1068_s4 + $0xa] sm:$0xff]  ;;  %v1184_v54 = vld [vmem:[%s1068_s4 + $0x2] sm:$0xff]  ;;  %v1191_v57 = vld [vmem:[%s1068_s4 + $0x32] sm:$0xff] }
  0x32   : > { %208 = vrot.lane.b32.xlu1 %v187_v7, %s978_s6  ;;  %200 = vrot.lane.b32.xlu0 %v183_v8, %s978_s6  ;;  %v359_v40 = vmul.f32 %v357_v39, %v1125_v26  ;;  %v358_v41 = vmul.f32 %v357_v39, %v1128_v28  ;;  %v363_v42 = vmul.f32 %v357_v39, %v1135_v31  ;;  %v433_v53 = vstv %s819_s16  ;;  %v1194_v58 = vld [vmem:[%s1068_s4 + $0x2a] sm:$0xff] }
  0x33   : > { %v362_v43 = vmul.f32 %v357_v39, %v1138_v32  ;;  %v315_v46 = vmul.f32 %v307_v27, %v1163_v44  ;;  %v311_v47 = vmul.f32 %v307_v27, %v1166_v45  ;;  %v364_v48 = vmul.f32 %v357_v39, %v1145_v35  ;;  %v1201_v61 = vld [vmem:[%s1068_s4 + $0x3a] sm:$0xff]  ;;  %v1204_v62 = vld [vmem:[%s1068_s4 + $0x12] sm:$0xff] }
  0x34   : > { %v360_v49 = vmul.f32 %v357_v39, %v1148_v36  ;;  %v365_v50 = vmul.f32 %v357_v39, %v1163_v44  ;;  %v361_v51 = vmul.f32 %v357_v39, %v1166_v45  ;;  %v435_v55 = vmul.f32 %v433_v53, %v1181_v52  ;;  %v1222_v13 = vld [vmem:[%s1068_s4 + $0x1a] sm:$0xff] }
  0x35   : > { %v434_v56 = vmul.f32 %v433_v53, %v1184_v54  ;;  %v439_v59 = vmul.f32 %v433_v53, %v1191_v57  ;;  %v438_v60 = vmul.f32 %v433_v53, %v1194_v58  ;;  %v440_v63 = vmul.f32 %v433_v53, %v1201_v61 }
  0x36   : > { %210 = vrot.lane.b32.xlu1 %v188_v11, %s978_s6  ;;  %202 = vrot.lane.b32.xlu0 %v184_v12, %s978_s6  ;;  %v436_v0 = vmul.f32 %v433_v53, %v1204_v62  ;;  %v483_v4 = vstv %s820_s17  ;;  %v1219_v12 = vld [vmem:[%s1068_s4 + $0x42] sm:$0xff]  ;;  %v538_v27 = vmul.f32 %v1145_v35, %v1145_v35  ;;  %s911_s4 = scalar_lea.vmem %s1347_s28, 1024 }
  0x37   : > { %v485_v5 = vmul.f32 %v483_v4, %v1181_v52  ;;  %v484_v7 = vmul.f32 %v483_v4, %v1184_v54  ;;  %v489_v8 = vmul.f32 %v483_v4, %v1191_v57  ;;  %v488_v11 = vmul.f32 %v483_v4, %v1194_v58  ;;  %p912_p9 = scmp.ne.s32.totalorder %s1347_s28, %s911_s4 }
  0x39   : > { %p913_p10 = pnand %p912_p9, %p1036_p5 }
  0x3a   : > { %250 = vrot.lane.b32.xlu1 %v233_v14, %s979_s7  ;;  %248 = vrot.lane.b32.xlu0 %v232_v15, %s979_s7  ;;  %v441_v14 = vmul.f32 %v433_v53, %v1219_v12  ;;  %v437_v15 = vmul.f32 %v433_v53, %v1222_v13 }
  0x3b   : > { %p914_p12 = pneg %p913_p10 }
  0x3e   : > { %258 = vrot.lane.b32.xlu1 %v237_v16, %s979_s7  ;;  %256 = vrot.lane.b32.xlu0 %v236_v17, %s979_s7  ;;  %v490_v16 = vmul.f32 %v483_v4, %v1201_v61  ;;  %v486_v17 = vmul.f32 %v483_v4, %v1204_v62 }
  0x42   : > { %212 = vrot.lane.b32.xlu1 %v189_v20, %s978_s6  ;;  %204 = vrot.lane.b32.xlu0 %v185_v21, %s978_s6  ;;  %v491_v20 = vmul.f32 %v483_v4, %v1219_v12  ;;  %v487_v21 = vmul.f32 %v483_v4, %v1222_v13 }
  0x46   : > { %260 = vrot.lane.b32.xlu1 %v238_v22, %s979_s7  ;;  %252 = vrot.lane.b32.xlu0 %v234_v23, %s979_s7  ;;  %v533_v22 = vmul.f32 %v1125_v26, %v1125_v26  ;;  %v532_v23 = vmul.f32 %v1128_v28, %v1128_v28 }
  0x4a   : > { %262 = vrot.lane.b32.xlu1 %v239_v24, %s979_s7  ;;  %254 = vrot.lane.b32.xlu0 %v235_v25, %s979_s7  ;;  %v537_v24 = vmul.f32 %v1135_v31, %v1135_v31  ;;  %v536_v25 = vmul.f32 %v1138_v32, %v1138_v32 }
  0x4e   : > { %326 = vrot.lane.b32.xlu1 %v309_v29, %s978_s6  ;;  %324 = vrot.lane.b32.xlu0 %v308_v30, %s978_s6  ;;  %v534_v29 = vmul.f32 %v1148_v36, %v1148_v36  ;;  %v539_v30 = vmul.f32 %v1163_v44, %v1163_v44 }
  0x52   : > { %334 = vrot.lane.b32.xlu1 %v313_v33, %s978_s6  ;;  %332 = vrot.lane.b32.xlu0 %v312_v34, %s978_s6  ;;  %v535_v33 = vmul.f32 %v1166_v45, %v1166_v45  ;;  %v171_v34 = vstv %s170_s21 }
  0x56   : > { %336 = vrot.lane.b32.xlu1 %v314_v37, %s978_s6  ;;  %328 = vrot.lane.b32.xlu0 %v310_v38, %s978_s6  ;;  %v176_v37 = vmul.f32 %v171_v34, %v1071_v1  ;;  %v289_v1 = vstv %s815_s22 }
  0x5a   : > { %376 = vrot.lane.b32.xlu1 %v359_v40, %s979_s7  ;;  %374 = vrot.lane.b32.xlu0 %v358_v41, %s979_s7  ;;  %v177_v41 = vmul.f32 %v171_v34, %v1077_v3  ;;  %v291_v3 = vmul.f32 %v289_v1, %v1125_v26 }
  0x5e   : > { %384 = vrot.lane.b32.xlu1 %v363_v42, %s979_s7  ;;  %382 = vrot.lane.b32.xlu0 %v362_v43, %s979_s7 }
  0x62   : > { %338 = vrot.lane.b32.xlu1 %v315_v46, %s978_s6  ;;  %330 = vrot.lane.b32.xlu0 %v311_v47, %s978_s6  ;;  %v178_v47 = vmul.f32 %v171_v34, %v1089_v9 }
  0x66   : > { %386 = vrot.lane.b32.xlu1 %v364_v48, %s979_s7  ;;  %378 = vrot.lane.b32.xlu0 %v360_v49, %s979_s7  ;;  %v174_v48 = vmul.f32 %v171_v34, %v1092_v10  ;;  %v172_v49 = vmul.f32 %v171_v34, %v1074_v2  ;;  %v295_v2 = vmul.f32 %v289_v1, %v1135_v31 }
  0x6a   : > { %388 = vrot.lane.b32.xlu1 %v365_v50, %s979_s7  ;;  %380 = vrot.lane.b32.xlu0 %v361_v51, %s979_s7  ;;  %v173_v50 = vmul.f32 %v171_v34, %v1082_v6  ;;  %v294_v6 = vmul.f32 %v289_v1, %v1138_v32 }
  0x6e   : > { %452 = vrot.lane.b32.xlu1 %v435_v55, %s978_s6  ;;  %450 = vrot.lane.b32.xlu0 %v434_v56, %s978_s6 }
  0x72   : > { %460 = vrot.lane.b32.xlu1 %v439_v59, %s978_s6  ;;  %458 = vrot.lane.b32.xlu0 %v438_v60, %s978_s6 }
  0x76   : > { %462 = vrot.lane.b32.xlu1 %v440_v63, %s978_s6  ;;  %454 = vrot.lane.b32.xlu0 %v436_v0, %s978_s6  ;;  %v290_v63 = vmul.f32 %v289_v1, %v1128_v28  ;;  %v179_v28 = vmul.f32 %v171_v34, %v1107_v18 }
  0x7a   : > { %502 = vrot.lane.b32.xlu1 %v485_v5, %s979_s7  ;;  %500 = vrot.lane.b32.xlu0 %v484_v7, %s979_s7 }
  0x7e   : > { %510 = vrot.lane.b32.xlu1 %v489_v8, %s979_s7  ;;  %508 = vrot.lane.b32.xlu0 %v488_v11, %s979_s7 }
  0x82   : > { %464 = vrot.lane.b32.xlu1 %v441_v14, %s978_s6  ;;  %456 = vrot.lane.b32.xlu0 %v437_v15, %s978_s6 }
  0x86   : > { %512 = vrot.lane.b32.xlu1 %v490_v16, %s979_s7  ;;  %504 = vrot.lane.b32.xlu0 %v486_v17, %s979_s7 }
  0x8a   : > { %514 = vrot.lane.b32.xlu1 %v491_v20, %s979_s7  ;;  %506 = vrot.lane.b32.xlu0 %v487_v21, %s979_s7  ;;  %v175_v21 = vmul.f32 %v171_v34, %v1110_v19 }
  0x8e   : > { %550 = vrot.lane.b32.xlu1 %v533_v22, %s978_s6  ;;  %548 = vrot.lane.b32.xlu0 %v532_v23, %s978_s6  ;;  %v296_v22 = vmul.f32 %v289_v1, %v1145_v35  ;;  %v292_v23 = vmul.f32 %v289_v1, %v1148_v36 }
  0x92   : > { %558 = vrot.lane.b32.xlu1 %v537_v24, %s978_s6  ;;  %556 = vrot.lane.b32.xlu0 %v536_v25, %s978_s6 }
  0x96   : > { %560 = vrot.lane.b32.xlu1 %v538_v27, %s978_s6  ;;  %552 = vrot.lane.b32.xlu0 %v534_v29, %s978_s6  ;;  %v297_v27 = vmul.f32 %v289_v1, %v1163_v44  ;;  %v293_v29 = vmul.f32 %v289_v1, %v1166_v45  ;;  %v415_v44 = vstv %s818_s23 }
  0x9a   : > { %562 = vrot.lane.b32.xlu1 %v539_v30, %s978_s6  ;;  %554 = vrot.lane.b32.xlu0 %v535_v33, %s978_s6  ;;  %s915_s6 = sshll.u32 %s980_s5, 4  ;;  %s916_s6 = int_to_ptr.vmem [resolvable:$false] %s915_s6 }
  0x9b   : > { %s917_s7 = scalar_lea.vmem %s916_s6, 2048  ;;  %p918_p13 = scmp.lt.s32.totalorder %s1347_s28, %s916_s6 }
  0x9c   : > { %p919_p0 = scmp.lt.s32.totalorder %s917_s7, %s911_s4 }
  0x9e   : > { %p920_p1 = por %p919_p0, %p918_p13 }
  0xa0   : > { %v207_v38 = vpop.permute.xlu1 %206  ;;  %v199_v39 = vpop.permute.xlu0 %198  ;;  %p921_p2 = pnand %p920_p1, %p914_p12 }
  0xa1   : > { %v226_v40 = vadd.f32 %v207_v38, %v176_v37  ;;  %v222_v59 = vadd.f32 %v199_v39, %v172_v49  ;;  %v417_v49 = vmul.f32 %v415_v44, %v1181_v52 }
  0xa4   : > { %v209_v42 = vpop.permute.xlu1 %208  ;;  %v201_v43 = vpop.permute.xlu0 %200 }
  0xa5   : > { %v227_v46 = vadd.f32 %v209_v42, %v177_v41  ;;  %v223_v60 = vadd.f32 %v201_v43, %v173_v50  ;;  %v416_v50 = vmul.f32 %v415_v44, %v1184_v54 }
  0xa8   : > { %v211_v51 = vpop.permute.xlu1 %210  ;;  %v203_v53 = vpop.permute.xlu0 %202 }
  0xa9   : > { %v228_v55 = vadd.f32 %v211_v51, %v178_v47  ;;  %v224_v56 = vadd.f32 %v203_v53, %v174_v48 }
  0xac   : > { %v251_v0 = vpop.permute.xlu1 %250  ;;  %v249_v4 = vpop.permute.xlu0 %248 }
  0xad   : > { %v273_v9 = vadd.f32 %v251_v0, %v223_v60  ;;  %v272_v5 = vadd.f32 %v249_v4, %v222_v59  ;;  %v420_v59 = vmul.f32 %v415_v44, %v1194_v58 }
  0xaf   : > { %v299_v10 = vadd.f32 %v291_v3, %v273_v9  ;;  %v298_v7 = vadd.f32 %v290_v63, %v272_v5 }
  0xb0   : > { %v259_v8 = vpop.permute.xlu1 %258  ;;  %v257_v11 = vpop.permute.xlu0 %256 }
  0xb1   : > { %v277_v14 = vadd.f32 %v259_v8, %v227_v46  ;;  %v276_v15 = vadd.f32 %v257_v11, %v226_v40  ;;  %v422_v11 = vmul.f32 %v415_v44, %v1201_v61 }
  0xb3   : > { %v303_v16 = vadd.f32 %v295_v2, %v277_v14  ;;  %v302_v17 = vadd.f32 %v294_v6, %v276_v15 }
  0xb4   : > { %v213_v20 = vpop.permute.xlu1 %212  ;;  %v205_v26 = vpop.permute.xlu0 %204 }
  0xb5   : > { %v229_v30 = vadd.f32 %v213_v20, %v179_v28  ;;  %v225_v33 = vadd.f32 %v205_v26, %v175_v21  ;;  %v419_v20 = vmul.f32 %v415_v44, %v1222_v13 }
  0xb8   : > { %v261_v24 = vpop.permute.xlu1 %260  ;;  %v253_v31 = vpop.permute.xlu0 %252 }
  0xb9   : > { %v278_v25 = vadd.f32 %v261_v24, %v228_v55  ;;  %v274_v32 = vadd.f32 %v253_v31, %v224_v56  ;;  %v421_v56 = vmul.f32 %v415_v44, %v1191_v57  ;;  %v418_v57 = vmul.f32 %v415_v44, %v1204_v62 }
  0xbb   : > { %v304_v37 = vadd.f32 %v296_v22, %v278_v25  ;;  %v300_v38 = vadd.f32 %v292_v23, %v274_v32 }
  0xbc   : > { %v263_v39 = vpop.permute.xlu1 %262  ;;  %v255_v18 = vpop.permute.xlu0 %254 }
  0xbd   : > { %v279_v40 = vadd.f32 %v263_v39, %v229_v30  ;;  %v275_v19 = vadd.f32 %v255_v18, %v225_v33 }
  0xbf   : > { %v305_v34 = vadd.f32 %v297_v27, %v279_v40  ;;  %v301_v35 = vadd.f32 %v293_v29, %v275_v19 }
  0xc0   : > { %v327_v41 = vpop.permute.xlu1 %326  ;;  %v325_v36 = vpop.permute.xlu0 %324 }
  0xc1   : > { %v349_v48 = vadd.f32 %v327_v41, %v299_v10  ;;  %v348_v45 = vadd.f32 %v325_v36, %v298_v7 }
  0xc4   : > { %v335_v42 = vpop.permute.xlu1 %334  ;;  %v333_v43 = vpop.permute.xlu0 %332 }
  0xc5   : > { %v353_v60 = vadd.f32 %v335_v42, %v303_v16  ;;  %v352_v3 = vadd.f32 %v333_v43, %v302_v17  ;;  %v423_v17 = vmul.f32 %v415_v44, %v1219_v12 }
  0xc8   : > { %v337_v46 = vpop.permute.xlu1 %336  ;;  %v329_v47 = vpop.permute.xlu0 %328 }
  0xc9   : > { %v354_v6 = vadd.f32 %v337_v46, %v304_v37  ;;  %v350_v8 = vadd.f32 %v329_v47, %v300_v38 }
  0xcc   : > { %v377_v51 = vpop.permute.xlu1 %376  ;;  %v375_v53 = vpop.permute.xlu0 %374 }
  0xcd   : > { %v399_v1 = vadd.f32 %v377_v51, %v349_v48  ;;  %v398_v55 = vadd.f32 %v375_v53, %v348_v45 }
  0xcf   : > { %v425_v63 = vadd.f32 %v417_v49, %v399_v1  ;;  %v424_v0 = vadd.f32 %v416_v50, %v398_v55 }
  0xd0   : > { %v385_v4 = vpop.permute.xlu1 %384  ;;  %v383_v9 = vpop.permute.xlu0 %382 }
  0xd1   : > { %v403_v5 = vadd.f32 %v385_v4, %v353_v60  ;;  %v402_v10 = vadd.f32 %v383_v9, %v352_v3 }
  0xd3   : > { %v429_v7 = vadd.f32 %v421_v56, %v403_v5  ;;  %v428_v52 = vadd.f32 %v420_v59, %v402_v10 }
  0xd4   : > { %v339_v2 = vpop.permute.xlu1 %338  ;;  %v331_v54 = vpop.permute.xlu0 %330 }
  0xd5   : > { %v355_v26 = vadd.f32 %v339_v2, %v305_v34  ;;  %v351_v28 = vadd.f32 %v331_v54, %v301_v35 }
  0xd8   : > { %v387_v14 = vpop.permute.xlu1 %386  ;;  %v379_v58 = vpop.permute.xlu0 %378 }
  0xd9   : > { %v404_v15 = vadd.f32 %v387_v14, %v354_v6  ;;  %v400_v16 = vadd.f32 %v379_v58, %v350_v8 }
  0xdb   : > { %v430_v21 = vadd.f32 %v422_v11, %v404_v15  ;;  %v426_v22 = vadd.f32 %v418_v57, %v400_v16 }
  0xdc   : > { %v389_v23 = vpop.permute.xlu1 %388  ;;  %v381_v24 = vpop.permute.xlu0 %380 }
  0xdd   : > { %v405_v31 = vadd.f32 %v389_v23, %v355_v26  ;;  %v401_v25 = vadd.f32 %v381_v24, %v351_v28 }
  0xdf   : > { %v431_v32 = vadd.f32 %v423_v17, %v405_v31  ;;  %v427_v61 = vadd.f32 %v419_v20, %v401_v25 }
  0xe0   : > { %v453_v27 = vpop.permute.xlu1 %452  ;;  %v451_v62 = vpop.permute.xlu0 %450 }
  0xe1   : > { %v475_v38 = vadd.f32 %v453_v27, %v425_v63  ;;  %v474_v12 = vadd.f32 %v451_v62, %v424_v0 }
  0xe4   : > { %v461_v29 = vpop.permute.xlu1 %460  ;;  %v459_v30 = vpop.permute.xlu0 %458 }
  0xe5   : > { %v479_v19 = vadd.f32 %v461_v29, %v429_v7  ;;  %v478_v34 = vadd.f32 %v459_v30, %v428_v52 }
  0xe8   : > { %v463_v33 = vpop.permute.xlu1 %462  ;;  %v455_v37 = vpop.permute.xlu0 %454 }
  0xe9   : > { %v480_v53 = vadd.f32 %v463_v33, %v430_v21  ;;  %v476_v1 = vadd.f32 %v455_v37, %v426_v22 }
  0xec   : > { %v503_v39 = vpop.permute.xlu1 %502  ;;  %v501_v13 = vpop.permute.xlu0 %500 }
  0xed   : > { %v1286_v18 = vadd.f32 %v503_v39, %v475_v38  ;;  %v1288_v40 = vadd.f32 %v501_v13, %v474_v12 }
  0xef   : > { %v616_v35 = vmul.f32 %v1286_v18, %v1286_v18  ;;  %v615_v41 = vmul.f32 %v1288_v40, %v1288_v40 }
  0xf0   : > { %v511_v36 = vpop.permute.xlu1 %510  ;;  %v509_v42 = vpop.permute.xlu0 %508 }
  0xf1   : > { %v1294_v43 = vadd.f32 %v511_v36, %v479_v19  ;;  %v1296_v46 = vadd.f32 %v509_v42, %v478_v34  ;;  %v626_v47 = vsel %vm572_vm0, %v616_v35, 0.0  ;;  %v623_v44 = vsel %vm572_vm0, %v615_v41, 0.0 }
  0xf2   : > { %627 = vadd.xlane.f32.xlu1 %v626_v47  ;;  %624 = vadd.xlane.f32.xlu0 %v623_v44 }
  0xf3   : > { %v619_v48 = vmul.f32 %v1296_v46, %v1296_v46  ;;  %v620_v51 = vmul.f32 %v1294_v43, %v1294_v43 }
  0xf4   : > { %v465_v45 = vpop.permute.xlu1 %464  ;;  %v457_v49 = vpop.permute.xlu0 %456 }
  0xf5   : > { %v635_v50 = vsel %vm572_vm0, %v619_v48, 0.0  ;;  %v638_v3 = vsel %vm572_vm0, %v620_v51, 0.0  ;;  %v481_v63 = vadd.f32 %v465_v45, %v431_v32  ;;  %v477_v0 = vadd.f32 %v457_v49, %v427_v61 }
  0xf6   : > { %636 = vadd.xlane.f32.xlu0 %v635_v50 }
  0xf8   : > { %v513_v55 = vpop.permute.xlu1 %512  ;;  %v505_v56 = vpop.permute.xlu0 %504 }
  0xf9   : > { %v1305_v59 = vadd.f32 %v513_v55, %v480_v53  ;;  %v1307_v60 = vadd.f32 %v505_v56, %v476_v1 }
  0xfa   : > { %639 = vadd.xlane.f32.xlu0 %v638_v3 }
  0xfb   : > { %v617_v4 = vmul.f32 %v1307_v60, %v1307_v60  ;;  %v621_v9 = vmul.f32 %v1305_v59, %v1305_v59 }
  0xfc   : > { %v515_v5 = vpop.permute.xlu1 %514  ;;  %v507_v10 = vpop.permute.xlu0 %506 }
  0xfd   : > { %v1314_v7 = vadd.f32 %v515_v5, %v481_v63  ;;  %v1316_v52 = vadd.f32 %v507_v10, %v477_v0  ;;  %v629_v2 = vsel %vm572_vm0, %v617_v4, 0.0  ;;  %v641_v54 = vsel %vm572_vm0, %v621_v9, 0.0 }
  0xfe   : > { %630 = vadd.xlane.f32.xlu1 %v629_v2  ;;  %642 = vadd.xlane.f32.xlu0 %v641_v54 }
  0xff   : > { %v618_v6 = vmul.f32 %v1316_v52, %v1316_v52  ;;  %v622_v8 = vmul.f32 %v1314_v7, %v1314_v7 }
 0x100   : > { %v551_v11 = vpop.permute.xlu1 %550  ;;  %v549_v57 = vpop.permute.xlu0 %548 }
 0x101   : > { %v632_v14 = vsel %vm572_vm0, %v618_v6, 0.0  ;;  %v644_v58 = vsel %vm572_vm0, %v622_v8, 0.0  ;;  %v573_v15 = vsel %vm572_vm0, %v549_v57, 0.0  ;;  %v576_v16 = vsel %vm572_vm0, %v551_v11, 0.0 }
 0x102   : > { %633 = vadd.xlane.f32.xlu1 %v632_v14  ;;  %645 = vadd.xlane.f32.xlu0 %v644_v58 }
 0x104   : > { %v559_v17 = vpop.permute.xlu1 %558  ;;  %v557_v20 = vpop.permute.xlu0 %556 }
 0x105   : > { %v585_v26 = vsel %vm572_vm0, %v557_v20, 0.0  ;;  %v588_v28 = vsel %vm572_vm0, %v559_v17, 0.0 }
 0x106   : > { %574 = vadd.xlane.f32.xlu1 %v573_v15  ;;  %577 = vadd.xlane.f32.xlu0 %v576_v16 }
 0x108   : > { %v561_v21 = vpop.permute.xlu1 %560  ;;  %v553_v22 = vpop.permute.xlu0 %552 }
 0x109   : > { %v579_v23 = vsel %vm572_vm0, %v553_v22, 0.0  ;;  %v591_v24 = vsel %vm572_vm0, %v561_v21, 0.0 }
 0x10a   : > { %586 = vadd.xlane.f32.xlu1 %v585_v26  ;;  %589 = vadd.xlane.f32.xlu0 %v588_v28 }
 0x10c   : > { %v563_v31 = vpop.permute.xlu1 %562  ;;  %v555_v25 = vpop.permute.xlu0 %554 }
 0x10d   : > { %v582_v32 = vsel %vm572_vm0, %v555_v25, 0.0  ;;  %v594_v61 = vsel %vm572_vm0, %v563_v31, 0.0 }
 0x10e   : > { %580 = vadd.xlane.f32.xlu1 %v579_v23  ;;  %592 = vadd.xlane.f32.xlu0 %v591_v24 }
 0x112   : > { %583 = vadd.xlane.f32.xlu1 %v582_v32  ;;  %595 = vadd.xlane.f32.xlu0 %v594_v61 }
 0x17b   : > { %v625_v27 = vpop.xlane.xlu0 %624  ;;  %v628_v29 = vpop.xlane.xlu1 %627 }
 0x17c   : > { %v647_v38 = vadd.f32 %v628_v29, %v625_v27 }
 0x17f   : > { %v637_v62 = vpop.xlane.xlu0 %636 }
 0x183   : > { %v640_v30 = vpop.xlane.xlu0 %639 }
 0x184   : > { %v656_v12 = vadd.f32 %v640_v30, %v637_v62 }
 0x187   : > { %v631_v33 = vpop.xlane.xlu1 %630  ;;  %v643_v37 = vpop.xlane.xlu0 %642 }
 0x188   : > { %v648_v39 = vadd.f32 %v647_v38, %v631_v33  ;;  %v657_v13 = vadd.f32 %v656_v12, %v643_v37 }
 0x18b   : > { %v634_v19 = vpop.xlane.xlu1 %633  ;;  %v646_v34 = vpop.xlane.xlu0 %645 }
 0x18c   : > { %v649_v35 = vadd.f32 %v648_v39, %v634_v19  ;;  %v658_v41 = vadd.f32 %v657_v13, %v646_v34 }
 0x18e   : > { %v650_v36 = vrot.slane %v649_v35, 4  ;;  %v659_v42 = vrot.slane %v658_v41, 4 }
 0x18f   : > { %v575_v47 = vpop.xlane.xlu1 %574  ;;  %v578_v44 = vpop.xlane.xlu0 %577 }
 0x190   : > { %v651_v48 = vadd.f32 %v650_v36, %v649_v35  ;;  %v660_v45 = vadd.f32 %v659_v42, %v658_v41  ;;  %v597_v5 = vadd.f32 %v578_v44, %v575_v47 }
 0x192   : > { %v652_v49 = vrot.slane %v651_v48, 2  ;;  %v661_v50 = vrot.slane %v660_v45, 2 }
 0x193   : > { %v587_v51 = vpop.xlane.xlu1 %586  ;;  %v590_v53 = vpop.xlane.xlu0 %589 }
 0x194   : > { %v653_v1 = vadd.f32 %v652_v49, %v651_v48  ;;  %v662_v55 = vadd.f32 %v661_v50, %v660_v45  ;;  %v606_v10 = vadd.f32 %v590_v53, %v587_v51 }
 0x196   : > { %v654_v56 = vrot.slane %v653_v1, 1  ;;  %v663_v3 = vrot.slane %v662_v55, 1 }
 0x197   : > { %v581_v63 = vpop.xlane.xlu1 %580  ;;  %v593_v0 = vpop.xlane.xlu0 %592 }
 0x198   : > { %v655_v4 = vadd.f32 %v654_v56, %v653_v1  ;;  %v664_v9 = vadd.f32 %v663_v3, %v662_v55  ;;  %v598_v2 = vadd.f32 %v597_v5, %v581_v63  ;;  %v607_v54 = vadd.f32 %v606_v10, %v593_v0 }
 0x19a   : > { %884 = vrsqrt.f32 %v655_v4  ;;  %vm681_vm1 = vcmp.eq.f32.partialorder %v655_v4, inf  ;;  %vm683_vm2 = vcmp.eq.f32.partialorder %v655_v4, 0.0  ;;  %v684_v61 = vand.u32 2147483648, %v655_v4 }
 0x19b   : > { %886 = vrsqrt.f32 %v664_v9  ;;  %v584_v6 = vpop.xlane.xlu1 %583  ;;  %v596_v8 = vpop.xlane.xlu0 %595  ;;  %vm688_vm3 = vcmp.eq.f32.partialorder %v664_v9, inf  ;;  %v691_v29 = vand.u32 2147483648, %v664_v9  ;;  %vm690_vm4 = vcmp.eq.f32.partialorder %v664_v9, 0.0 }
 0x19c   : > { %v599_v11 = vadd.f32 %v598_v2, %v584_v6  ;;  %v608_v57 = vadd.f32 %v607_v54, %v596_v8 }
 0x19e   : > { %v600_v14 = vrot.slane %v599_v11, 4  ;;  %v609_v58 = vrot.slane %v608_v57, 4 }
 0x1a0   : > { %v601_v15 = vadd.f32 %v600_v14, %v599_v11  ;;  %v610_v16 = vadd.f32 %v609_v58, %v608_v57 }
 0x1a2   : > { %v602_v17 = vrot.slane %v601_v15, 2  ;;  %v611_v20 = vrot.slane %v610_v16, 2 }
 0x1a4   : > { %v603_v26 = vadd.f32 %v602_v17, %v601_v15  ;;  %v612_v28 = vadd.f32 %v611_v20, %v610_v16 }
 0x1a6   : > { %v604_v21 = vrot.slane %v603_v26, 1  ;;  %v613_v22 = vrot.slane %v612_v28, 1 }
 0x1a7   : > { %v885_v23 = vpop.eup %884 }
 0x1a8   : > { %v887_v24 = vpop.eup %886  ;;  %v680_v31 = vmul.f32 %v885_v23, %v655_v4  ;;  %v605_v25 = vadd.f32 %v604_v21, %v603_v26  ;;  %v614_v32 = vadd.f32 %v613_v22, %v612_v28 }
 0x1a9   : > { %v687_v27 = vmul.f32 %v887_v24, %v664_v9 }
 0x1aa   : > { %v682_v62 = vsel %vm681_vm1, %v655_v4, %v680_v31  ;;  %888 = vrsqrt.f32 %v605_v25  ;;  %vm667_vm5 = vcmp.eq.f32.partialorder %v605_v25, inf  ;;  %v670_v34 = vand.u32 2147483648, %v605_v25 }
 0x1ab   : > { %v685_v30 = vsel %vm683_vm2, %v684_v61, %v682_v62  ;;  %v689_v33 = vsel %vm688_vm3, %v664_v9, %v687_v27  ;;  %890 = vrsqrt.f32 %v614_v32  ;;  %vm669_vm6 = vcmp.eq.f32.partialorder %v605_v25, 0.0 }
 0x1ac   : > { %v693_v37 = vadd.f32 1e-06, %v685_v30  ;;  %v692_v38 = vsel %vm690_vm4, %v691_v29, %v689_v33  ;;  %vm674_vm7 = vcmp.eq.f32.partialorder %v614_v32, inf  ;;  %v677_v36 = vand.u32 2147483648, %v614_v32 }
 0x1ad   : > { %v694_v12 = vadd.f32 1e-06, %v692_v38  ;;  %vm676_vm8 = vcmp.eq.f32.partialorder %v614_v32, 0.0 }
 0x1ae   : > { %892 = vrcp.f32 %v693_v37 }
 0x1af   : > { %894 = vrcp.f32 %v694_v12 }
 0x1b7   : > { %v889_v39 = vpop.eup %888 }
 0x1b8   : > { %v891_v13 = vpop.eup %890  ;;  %v666_v19 = vmul.f32 %v889_v39, %v605_v25 }
 0x1b9   : > { %v673_v35 = vmul.f32 %v891_v13, %v614_v32 }
 0x1ba   : > { %v668_v41 = vsel %vm667_vm5, %v605_v25, %v666_v19 }
 0x1bb   : > { %v893_v42 = vpop.eup %892  ;;  %v671_v47 = vsel %vm669_vm6, %v670_v34, %v668_v41  ;;  %v675_v44 = vsel %vm674_vm7, %v614_v32, %v673_v35 }
 0x1bc   : > { %v895_v48 = vpop.eup %894  ;;  %v696_v45 = vmul.f32 %v893_v42, %v671_v47  ;;  %v678_v49 = vsel %vm676_vm8, %v677_v36, %v675_v44 }
 0x1bd   : > { %v698_v50 = vmul.f32 %v895_v48, %v678_v49 }
 0x1be   : > { %v699_v51 = vmul.f32 %v696_v45, %v1288_v40  ;;  %v700_v53 = vmul.f32 %v696_v45, %v1286_v18  ;;  %v701_v1 = vmul.f32 %v696_v45, %v1307_v60  ;;  %v702_v55 = vmul.f32 %v696_v45, %v1316_v52 }
 0x1bf   : > { %v703_v56 = vmul.f32 %v698_v50, %v1296_v46  ;;  %v704_v40 = vmul.f32 %v698_v50, %v1294_v43  ;;  %v705_v18 = vmul.f32 %v698_v50, %v1305_v59  ;;  %v706_v60 = vmul.f32 %v698_v50, %v1314_v7 }
 0x1c0   : > { %707 = vst.msk [vmem:[%s153_s27] sm:$0xff] %vm572_vm0, %v699_v51  ;;  %708 = vst.msk [vmem:[%s153_s27 + $0x8] sm:$0xff] %vm572_vm0, %v700_v53 }
 0x1c1   : > { %709 = vst.msk [vmem:[%s153_s27 + $0x10] sm:$0xff] %vm572_vm0, %v701_v1  ;;  %710 = vst.msk [vmem:[%s153_s27 + $0x18] sm:$0xff] %vm572_vm0, %v702_v55 }
 0x1c2   : > { %711 = vst.msk [vmem:[%s153_s27 + $0x20] sm:$0xff] %vm572_vm0, %v703_v56  ;;  %712 = vst.msk [vmem:[%s153_s27 + $0x28] sm:$0xff] %vm572_vm0, %v704_v40 }
 0x1c3   : > { %713 = vst.msk [vmem:[%s153_s27 + $0x30] sm:$0xff] %vm572_vm0, %v705_v18  ;;  %714 = vst.msk [vmem:[%s153_s27 + $0x38] sm:$0xff] %vm572_vm0, %v706_v60 }
 0x1c4   : > { %924 = shalt.err (!%p921_p2)
}
 0x1c5   : > { %s925_s8 = scalar_lea.hbm %s1345_s3, 1024  ;;  %s929_s17 = scalar_lea.hbm %s1405_s2, 8192 }
 0x1c6   : > { %p926_p3 = scmp.ne.s32.totalorder %s1345_s3, %s925_s8  ;;  %p930_p8 = scmp.lt.s32.totalorder %s1345_s3, %s1405_s2 }
 0x1c7   : > { %p931_p11 = scmp.lt.s32.totalorder %s929_s17, %s925_s8 }
 0x1c8   : > { %p927_p4 = pnand %p926_p3, %p1036_p5 }
 0x1c9   : > { %p932_p9 = por %p931_p11, %p930_p8 }
 0x1ca   : > { %p928_p7 = pneg %p927_p4 }
 0x1cc   : > { %p933_p10 = pnand %p932_p9, %p928_p7 }
 0x1ce   : > { %936 = shalt.err (!%p933_p10)
}
 0x1cf   : > { %s981_s23 = smov 128   ;;  %s982_s24 = smov 8  }
 0x1d0   : > { %834 = dma.vmem_to_hbm [thread:$0]  (%p1036_p5), %s1347_s28, 1024, %s1345_s3, %s1363_s13, %s981_s23, %s981_s23, %s982_s24  }
 0x1d1 PF: > { %p846_p12 = scmp.ge.s32.totalorder %s975_s12, 2  ;;  %s745_s25 = sand.u32 1, %s963_s9  }
 0x1d2   : > { %s746_s26 = scalar_lea.sflag [#allocation3], %s745_s25 }
 0x1d3   : > { %p841_p13 = pnand %p846_p12, %p1040_p6 }
 0x1d5   : > { %p842_p0 = pneg %p841_p13 }
 0x1d7   : > { %958 = dma.done.wait (%p842_p0), %s746_s26, 1024  }
 0x1d8   : > { %960 = vsyncadd (%p842_p0), %s746_s26, 4294966272  ;;  %p13_p1 = scmp.ge.s32.totalorder %s1023_s15, 10   ;;  %s1409_s9 = smov %s967_s10 }
 0x1d9   : > { %s1410_s10 = smov %s971_s11  ;;  %s1411_s11 = smov %s1034_s18 }
 0x1da   : > { %s1412_s12 = smov %s1023_s15  ;;  %15 = sbr.rel (!%p13_p1) target bundleno = 4 (0x4), region = 68 }
 0x1df   :  { %751 = vsyncpa [#allocation3], 1 }
 0x1e0   :  { %753 = vsyncpa [#allocation3 + $0x1], 1 }
 0x1e1   :  { %754 = vsyncpa [#allocation4], 1 }
 0x1e2   :  { %756 = vsyncpa [#allocation4 + $0x1], 1 }

</bundles_post_ra>
